<compile_context>
chip_gen: v5e
topology: v5e:2x2
jax: 0.10.0
libtpu: 0.0.40
codegen_flags: <defaults>
</compile_context>

<pallas_src>
import functools

import jax
import jax.numpy as jnp
from jax.experimental import pallas as pl
from jax.experimental.pallas import tpu as pltpu


def _dirichlet_bnd_kernel(inv2_ref,                      # SMEM (1,1): 1/data_norm^2
                          ox_ref, oy_ref, oz_ref,        # output faces (1,2,·,·)
                          gx_ref, gy_ref, gz_ref,        # domain faces * data_norm (2,·,·)
                          loss_ref,                      # (1,1) output
                          ax_ref, ay_ref, az_ref,        # VMEM accumulators (2,·,·)
                          *, nnx, nny, nnz, weight, batch):
    b = pl.program_id(0)

    @pl.when(b == 0)
    def _init():
        ax_ref[...] = jnp.zeros_like(ax_ref)
        ay_ref[...] = jnp.zeros_like(ay_ref)
        az_ref[...] = jnp.zeros_like(az_ref)

    # Pure VPU work per grid step: squared differences accumulated elementwise.
    # diff = o - data_norm*d, so SSE(diff) * inv_norm^2 == SSE(o/data_norm - d).
    dx = ox_ref[0].astype(jnp.float32) - gx_ref[...]     # (2, nny, nnz)
    dy = oy_ref[0].astype(jnp.float32) - gy_ref[...]     # (2, nnx, nnz)
    dz = oz_ref[0].astype(jnp.float32) - gz_ref[...]     # (2, nnx, nny)
    ax_ref[...] = ax_ref[...] + dx * dx
    ay_ref[...] = ay_ref[...] + dy * dy
    az_ref[...] = az_ref[...] + dz * dz

    @pl.when(b == pl.num_programs(0) - 1)
    def _finalize():
        # Single set of cross-lane reductions for the whole kernel.
        s = (jnp.sum(ax_ref[...]) * (1.0 / float(nny * nnz))
             + jnp.sum(ay_ref[...]) * (1.0 / float(nnx * nnz))
             + jnp.sum(az_ref[...]) * (1.0 / float(nnx * nny)))
        total = s * inv2_ref[0, 0] * (float(weight) / float(batch))
        loss_ref[...] = jnp.zeros_like(loss_ref) + total


def dirichlet_boundary_loss(output, domain, *, weight, data_norm=1.0):
    """output: (B, C, nnx, nny, nnz); domain: (nnx, nny, nnz) f32. Returns scalar loss."""
    batch, _, nnx, nny, nnz = output.shape

    # Slice only the boundary faces (O(N^2) HBM reads); keep the input dtype — the cast
    # to f32 happens inside the kernel.
    # TODO(synk): PyTorch mutates `output` in place (output /= data_norm); JAX is
    # functional, so only the returned loss value is reproduced.
    xf = jnp.stack([output[:, 0, 0, :, :], output[:, 0, nnx - 1, :, :]], axis=1)  # (B,2,nny,nnz)
    yf = jnp.stack([output[:, 0, :, 0, :], output[:, 0, :, nny - 1, :]], axis=1)  # (B,2,nnx,nnz)
    zf = jnp.stack([output[:, 0, :, :, 0], output[:, 0, :, :, nnz - 1]], axis=1)  # (B,2,nnx,nny)

    dn = jnp.asarray(data_norm, dtype=jnp.float32)
    domain = domain.astype(jnp.float32)
    gx = jnp.stack([domain[0, :, :], domain[nnx - 1, :, :]], axis=0) * dn          # (2,nny,nnz)
    gy = jnp.stack([domain[:, 0, :], domain[:, nny - 1, :]], axis=0) * dn          # (2,nnx,nnz)
    gz = jnp.stack([domain[:, :, 0], domain[:, :, nnz - 1]], axis=0) * dn          # (2,nnx,nny)

    inv2 = jnp.reshape((1.0 / dn) * (1.0 / dn), (1, 1)).astype(jnp.float32)        # SMEM scalar

    kernel = functools.partial(_dirichlet_bnd_kernel,
                               nnx=nnx, nny=nny, nnz=nnz,
                               weight=weight, batch=batch)

    loss = pl.pallas_call(
        kernel,
        out_shape=jax.ShapeDtypeStruct((1, 1), jnp.float32),
        grid_spec=pltpu.PrefetchScalarGridSpec(
            num_scalar_prefetch=0,
            grid=(batch,),
            in_specs=[
                pl.BlockSpec(memory_space=pltpu.MemorySpace.SMEM),                  # inv2
                pl.BlockSpec((1, 2, nny, nnz), lambda b: (b, 0, 0, 0)),             # x-faces
                pl.BlockSpec((1, 2, nnx, nnz), lambda b: (b, 0, 0, 0)),             # y-faces
                pl.BlockSpec((1, 2, nnx, nny), lambda b: (b, 0, 0, 0)),             # z-faces
                pl.BlockSpec((2, nny, nnz), lambda b: (0, 0, 0)),                   # domain x (resident)
                pl.BlockSpec((2, nnx, nnz), lambda b: (0, 0, 0)),                   # domain y (resident)
                pl.BlockSpec((2, nnx, nny), lambda b: (0, 0, 0)),                   # domain z (resident)
            ],
            out_specs=pl.BlockSpec((1, 1), lambda b: (0, 0)),
            scratch_shapes=[
                pltpu.VMEM((2, nny, nnz), jnp.float32),
                pltpu.VMEM((2, nnx, nnz), jnp.float32),
                pltpu.VMEM((2, nnx, nny), jnp.float32),
            ],
        ),
        compiler_params=pltpu.CompilerParams(
            dimension_semantics=("arbitrary",)),          # batch axis carries the accumulators
    )(inv2, xf, yf, zf, gx, gy, gz)
    return loss[0, 0]


def build_domain(xmin, xmax, ymin, ymax, zmin, zmax, nnx, nny, nnz):
    x = jnp.linspace(xmin, xmax, nnx)
    y = jnp.linspace(ymin, ymax, nny)
    z = jnp.linspace(zmin, zmax, nnz)
    X, Y, Z = jnp.meshgrid(x, y, z, indexing="ij")        # torch.meshgrid default 'ij'
    return (X ** 3 + Y ** 3 + Z ** 3).astype(jnp.float32)


def reference_loss(output, domain, *, weight, data_norm=1.0):
    o = output[:, 0].astype(jnp.float32) / data_norm
    d = jnp.broadcast_to(domain[None], o.shape)
    loss = (jnp.mean((o[:, -1, :, :] - d[:, -1, :, :]) ** 2)
            + jnp.mean((o[:, :, 0, :] - d[:, :, 0, :]) ** 2)
            + jnp.mean((o[:, :, -1, :] - d[:, :, -1, :]) ** 2)
            + jnp.mean((o[:, 0, :, :] - d[:, 0, :, :]) ** 2)
            + jnp.mean((o[:, :, :, 0] - d[:, :, :, 0]) ** 2)
            + jnp.mean((o[:, :, :, -1] - d[:, :, :, -1]) ** 2))
    return loss * weight


if __name__ == "__main__":
    # Module "parameters" (deterministic, set in-script)
    bound_weight = 1.0
    xmin, xmax, ymin, ymax, zmin, zmax = 0.0, 1.0, 0.0, 1.0, 0.0, 1.0
    nnx, nny, nnz = 16, 16, 16
    batch, channels = 2, 1
    data_norm = 2.0

    domain = build_domain(xmin, xmax, ymin, ymax, zmin, zmax, nnx, nny, nnz)

    key = jax.random.PRNGKey(0)
    output = jax.random.normal(key, (batch, channels, nnx, nny, nnz), dtype=jnp.float32)

    loss = dirichlet_boundary_loss(output, domain,
                                   weight=bound_weight, data_norm=data_norm)
    loss = jax.block_until_ready(loss)

    ref = jax.block_until_ready(
        reference_loss(output, domain, weight=bound_weight, data_norm=data_norm))
    assert jnp.allclose(loss, ref, rtol=1e-5, atol=1e-6), (loss, ref)

    print("KERNEL_OK")
</pallas_src>

<mosaic_0001>
module attributes {stable_mosaic.version = 11 : i64} {
  func.func @_dirichlet_bnd_kernel(%arg0: i32, %arg1: memref<1x1xf32, #tpu.memory_space<smem>>, %arg2: memref<1x2x16x16xf32, #tpu.memory_space<vmem>>, %arg3: memref<1x2x16x16xf32, #tpu.memory_space<vmem>>, %arg4: memref<1x2x16x16xf32, #tpu.memory_space<vmem>>, %arg5: memref<2x16x16xf32, #tpu.memory_space<vmem>>, %arg6: memref<2x16x16xf32, #tpu.memory_space<vmem>>, %arg7: memref<2x16x16xf32, #tpu.memory_space<vmem>>, %arg8: memref<1x1xf32, #tpu.memory_space<vmem>>, %arg9: memref<2x16x16xf32, #tpu.memory_space<vmem>>, %arg10: memref<2x16x16xf32, #tpu.memory_space<vmem>>, %arg11: memref<2x16x16xf32, #tpu.memory_space<vmem>>) attributes {dimension_semantics = [#tpu.dimension_semantics<arbitrary>], iteration_bounds = array<i64: 2>, scalar_prefetch = 0 : i64, scratch_operands = 3 : i64, tpu.core_type = #tpu.core_type<tc>, window_params = [{transform_indices = @transform_0, window_bounds = array<i64: 1, 1>}, {transform_indices = @transform_1, window_bounds = array<i64: 1, 2, 16, 16>}, {transform_indices = @transform_2, window_bounds = array<i64: 1, 2, 16, 16>}, {transform_indices = @transform_3, window_bounds = array<i64: 1, 2, 16, 16>}, {pipeline_mode = #tpu.pipeline_mode<synchronous>, transform_indices = @transform_4, window_bounds = array<i64: 2, 16, 16>}, {pipeline_mode = #tpu.pipeline_mode<synchronous>, transform_indices = @transform_5, window_bounds = array<i64: 2, 16, 16>}, {pipeline_mode = #tpu.pipeline_mode<synchronous>, transform_indices = @transform_6, window_bounds = array<i64: 2, 16, 16>}, {pipeline_mode = #tpu.pipeline_mode<synchronous>, transform_indices = @transform_7, window_bounds = array<i64: 1, 1>}]} {
    %c0_i32 = arith.constant 0 : i32
    %0 = arith.cmpi eq, %arg0, %c0_i32 : i32
    %1 = arith.extui %0 : i1 to i32
    %c0_i32_0 = arith.constant 0 : i32
    %2 = arith.cmpi ne, %1, %c0_i32_0 : i32
    scf.if %2 {
      %cst = arith.constant 0.000000e+00 : f32
      %30 = vector.broadcast %cst : f32 to vector<2x16x16xf32>
      %c0_40 = arith.constant 0 : index
      %c0_41 = arith.constant 0 : index
      %c0_42 = arith.constant 0 : index
      %31 = vector.load %arg9[%c0_40, %c0_41, %c0_42] : memref<2x16x16xf32, #tpu.memory_space<vmem>>, vector<2x16x16xf32>
      tpu.vector_store %arg9[%c0_40, %c0_41, %c0_42], %30 {strides = array<i32>} : memref<2x16x16xf32, #tpu.memory_space<vmem>>, vector<2x16x16xf32>,
      %cst_43 = arith.constant 0.000000e+00 : f32
      %32 = vector.broadcast %cst_43 : f32 to vector<2x16x16xf32>
      %c0_44 = arith.constant 0 : index
      %c0_45 = arith.constant 0 : index
      %c0_46 = arith.constant 0 : index
      %33 = vector.load %arg10[%c0_44, %c0_45, %c0_46] : memref<2x16x16xf32, #tpu.memory_space<vmem>>, vector<2x16x16xf32>
      tpu.vector_store %arg10[%c0_44, %c0_45, %c0_46], %32 {strides = array<i32>} : memref<2x16x16xf32, #tpu.memory_space<vmem>>, vector<2x16x16xf32>,
      %cst_47 = arith.constant 0.000000e+00 : f32
      %34 = vector.broadcast %cst_47 : f32 to vector<2x16x16xf32>
      %c0_48 = arith.constant 0 : index
      %c0_49 = arith.constant 0 : index
      %c0_50 = arith.constant 0 : index
      %35 = vector.load %arg11[%c0_48, %c0_49, %c0_50] : memref<2x16x16xf32, #tpu.memory_space<vmem>>, vector<2x16x16xf32>
      tpu.vector_store %arg11[%c0_48, %c0_49, %c0_50], %34 {strides = array<i32>} : memref<2x16x16xf32, #tpu.memory_space<vmem>>, vector<2x16x16xf32>,
    } else {
    }
    %c0 = arith.constant 0 : index
    %c0_1 = arith.constant 0 : index
    %c0_2 = arith.constant 0 : index
    %c0_3 = arith.constant 0 : index
    %3 = vector.load %arg2[%c0, %c0_1, %c0_2, %c0_3] : memref<1x2x16x16xf32, #tpu.memory_space<vmem>>, vector<1x2x16x16xf32>
    %4 = vector.shape_cast %3 : vector<1x2x16x16xf32> to vector<2x16x16xf32>
    %c0_4 = arith.constant 0 : index
    %c0_5 = arith.constant 0 : index
    %c0_6 = arith.constant 0 : index
    %5 = vector.load %arg5[%c0_4, %c0_5, %c0_6] : memref<2x16x16xf32, #tpu.memory_space<vmem>>, vector<2x16x16xf32>
    %6 = arith.subf %4, %5 : vector<2x16x16xf32>
    %c0_7 = arith.constant 0 : index
    %c0_8 = arith.constant 0 : index
    %c0_9 = arith.constant 0 : index
    %c0_10 = arith.constant 0 : index
    %7 = vector.load %arg3[%c0_7, %c0_8, %c0_9, %c0_10] : memref<1x2x16x16xf32, #tpu.memory_space<vmem>>, vector<1x2x16x16xf32>
    %8 = vector.shape_cast %7 : vector<1x2x16x16xf32> to vector<2x16x16xf32>
    %c0_11 = arith.constant 0 : index
    %c0_12 = arith.constant 0 : index
    %c0_13 = arith.constant 0 : index
    %9 = vector.load %arg6[%c0_11, %c0_12, %c0_13] : memref<2x16x16xf32, #tpu.memory_space<vmem>>, vector<2x16x16xf32>
    %10 = arith.subf %8, %9 : vector<2x16x16xf32>
    %c0_14 = arith.constant 0 : index
    %c0_15 = arith.constant 0 : index
    %c0_16 = arith.constant 0 : index
    %c0_17 = arith.constant 0 : index
    %11 = vector.load %arg4[%c0_14, %c0_15, %c0_16, %c0_17] : memref<1x2x16x16xf32, #tpu.memory_space<vmem>>, vector<1x2x16x16xf32>
    %12 = vector.shape_cast %11 : vector<1x2x16x16xf32> to vector<2x16x16xf32>
    %c0_18 = arith.constant 0 : index
    %c0_19 = arith.constant 0 : index
    %c0_20 = arith.constant 0 : index
    %13 = vector.load %arg7[%c0_18, %c0_19, %c0_20] : memref<2x16x16xf32, #tpu.memory_space<vmem>>, vector<2x16x16xf32>
    %14 = arith.subf %12, %13 : vector<2x16x16xf32>
    %c0_21 = arith.constant 0 : index
    %c0_22 = arith.constant 0 : index
    %c0_23 = arith.constant 0 : index
    %15 = vector.load %arg9[%c0_21, %c0_22, %c0_23] : memref<2x16x16xf32, #tpu.memory_space<vmem>>, vector<2x16x16xf32>
    %16 = arith.mulf %6, %6 : vector<2x16x16xf32>
    %17 = arith.addf %15, %16 : vector<2x16x16xf32>
    %c0_24 = arith.constant 0 : index
    %c0_25 = arith.constant 0 : index
    %c0_26 = arith.constant 0 : index
    %18 = vector.load %arg9[%c0_24, %c0_25, %c0_26] : memref<2x16x16xf32, #tpu.memory_space<vmem>>, vector<2x16x16xf32>
    tpu.vector_store %arg9[%c0_24, %c0_25, %c0_26], %17 {strides = array<i32>} : memref<2x16x16xf32, #tpu.memory_space<vmem>>, vector<2x16x16xf32>,
    %c0_27 = arith.constant 0 : index
    %c0_28 = arith.constant 0 : index
    %c0_29 = arith.constant 0 : index
    %19 = vector.load %arg10[%c0_27, %c0_28, %c0_29] : memref<2x16x16xf32, #tpu.memory_space<vmem>>, vector<2x16x16xf32>
    %20 = arith.mulf %10, %10 : vector<2x16x16xf32>
    %21 = arith.addf %19, %20 : vector<2x16x16xf32>
    %c0_30 = arith.constant 0 : index
    %c0_31 = arith.constant 0 : index
    %c0_32 = arith.constant 0 : index
    %22 = vector.load %arg10[%c0_30, %c0_31, %c0_32] : memref<2x16x16xf32, #tpu.memory_space<vmem>>, vector<2x16x16xf32>
    tpu.vector_store %arg10[%c0_30, %c0_31, %c0_32], %21 {strides = array<i32>} : memref<2x16x16xf32, #tpu.memory_space<vmem>>, vector<2x16x16xf32>,
    %c0_33 = arith.constant 0 : index
    %c0_34 = arith.constant 0 : index
    %c0_35 = arith.constant 0 : index
    %23 = vector.load %arg11[%c0_33, %c0_34, %c0_35] : memref<2x16x16xf32, #tpu.memory_space<vmem>>, vector<2x16x16xf32>
    %24 = arith.mulf %14, %14 : vector<2x16x16xf32>
    %25 = arith.addf %23, %24 : vector<2x16x16xf32>
    %c0_36 = arith.constant 0 : index
    %c0_37 = arith.constant 0 : index
    %c0_38 = arith.constant 0 : index
    %26 = vector.load %arg11[%c0_36, %c0_37, %c0_38] : memref<2x16x16xf32, #tpu.memory_space<vmem>>, vector<2x16x16xf32>
    tpu.vector_store %arg11[%c0_36, %c0_37, %c0_38], %25 {strides = array<i32>} : memref<2x16x16xf32, #tpu.memory_space<vmem>>, vector<2x16x16xf32>,
    %c1_i32 = arith.constant 1 : i32
    %27 = arith.cmpi eq, %arg0, %c1_i32 : i32
    %28 = arith.extui %27 : i1 to i32
    %c0_i32_39 = arith.constant 0 : i32
    %29 = arith.cmpi ne, %28, %c0_i32_39 : i32
    scf.if %29 {
      %c0_40 = arith.constant 0 : index
      %c0_41 = arith.constant 0 : index
      %c0_42 = arith.constant 0 : index
      %30 = vector.load %arg9[%c0_40, %c0_41, %c0_42] : memref<2x16x16xf32, #tpu.memory_space<vmem>>, vector<2x16x16xf32>
      %31 = vector.shape_cast %30 : vector<2x16x16xf32> to vector<1x2x16x16xf32>
      %cst = arith.constant dense<0.000000e+00> : vector<1xf32>
      %32 = vector.multi_reduction <add>, %31, %cst [1, 2, 3] : vector<1x2x16x16xf32> to vector<1xf32>
      %33 = vector.shape_cast %32 : vector<1xf32> to vector<1x1x1x1xf32>
      %34 = vector.extract %33[0, 0, 0, 0] : f32 from vector<1x1x1x1xf32>
      %cst_43 = arith.constant 3.906250e-03 : f32
      %35 = arith.mulf %34, %cst_43 : f32
      %c0_44 = arith.constant 0 : index
      %c0_45 = arith.constant 0 : index
      %c0_46 = arith.constant 0 : index
      %36 = vector.load %arg10[%c0_44, %c0_45, %c0_46] : memref<2x16x16xf32, #tpu.memory_space<vmem>>, vector<2x16x16xf32>
      %37 = vector.shape_cast %36 : vector<2x16x16xf32> to vector<1x2x16x16xf32>
      %cst_47 = arith.constant dense<0.000000e+00> : vector<1xf32>
      %38 = vector.multi_reduction <add>, %37, %cst_47 [1, 2, 3] : vector<1x2x16x16xf32> to vector<1xf32>
      %39 = vector.shape_cast %38 : vector<1xf32> to vector<1x1x1x1xf32>
      %40 = vector.extract %39[0, 0, 0, 0] : f32 from vector<1x1x1x1xf32>
      %cst_48 = arith.constant 3.906250e-03 : f32
      %41 = arith.mulf %40, %cst_48 : f32
      %42 = arith.addf %35, %41 : f32
      %c0_49 = arith.constant 0 : index
      %c0_50 = arith.constant 0 : index
      %c0_51 = arith.constant 0 : index
      %43 = vector.load %arg11[%c0_49, %c0_50, %c0_51] : memref<2x16x16xf32, #tpu.memory_space<vmem>>, vector<2x16x16xf32>
      %44 = vector.shape_cast %43 : vector<2x16x16xf32> to vector<1x2x16x16xf32>
      %cst_52 = arith.constant dense<0.000000e+00> : vector<1xf32>
      %45 = vector.multi_reduction <add>, %44, %cst_52 [1, 2, 3] : vector<1x2x16x16xf32> to vector<1xf32>
      %46 = vector.shape_cast %45 : vector<1xf32> to vector<1x1x1x1xf32>
      %47 = vector.extract %46[0, 0, 0, 0] : f32 from vector<1x1x1x1xf32>
      %cst_53 = arith.constant 3.906250e-03 : f32
      %48 = arith.mulf %47, %cst_53 : f32
      %49 = arith.addf %42, %48 : f32
      %c0_54 = arith.constant 0 : index
      %c0_55 = arith.constant 0 : index
      %50 = memref.load %arg1[%c0_54, %c0_55] : memref<1x1xf32, #tpu.memory_space<smem>>
      %51 = arith.mulf %49, %50 : f32
      %cst_56 = arith.constant 5.000000e-01 : f32
      %52 = arith.mulf %51, %cst_56 : f32
      %cst_57 = arith.constant 0.000000e+00 : f32
      %53 = vector.broadcast %cst_57 : f32 to vector<1x1xf32>
      %54 = vector.broadcast %52 : f32 to vector<1x1xf32>
      %55 = arith.addf %53, %54 : vector<1x1xf32>
      %c0_58 = arith.constant 0 : index
      %c0_59 = arith.constant 0 : index
      %56 = vector.load %arg8[%c0_58, %c0_59] : memref<1x1xf32, #tpu.memory_space<vmem>>, vector<1x1xf32>
      tpu.vector_store %arg8[%c0_58, %c0_59], %55 {strides = array<i32>} : memref<1x1xf32, #tpu.memory_space<vmem>>, vector<1x1xf32>,
    } else {
    }
    return
  }
  func.func @transform_0(%arg0: i32) -> (i32, i32) {
    %c0_i32 = arith.constant 0 : i32
    %c0_i32_0 = arith.constant 0 : i32
    %c0_i32_1 = arith.constant 0 : i32
    return %c0_i32, %c0_i32_0 : i32, i32
  }
  func.func @transform_1(%arg0: i32) -> (i32, i32, i32, i32) {
    %c0_i32 = arith.constant 0 : i32
    %c0_i32_0 = arith.constant 0 : i32
    %c0_i32_1 = arith.constant 0 : i32
    %c0_i32_2 = arith.constant 0 : i32
    return %arg0, %c0_i32, %c0_i32_0, %c0_i32_1 : i32, i32, i32, i32
  }
  func.func @transform_2(%arg0: i32) -> (i32, i32, i32, i32) {
    %c0_i32 = arith.constant 0 : i32
    %c0_i32_0 = arith.constant 0 : i32
    %c0_i32_1 = arith.constant 0 : i32
    %c0_i32_2 = arith.constant 0 : i32
    return %arg0, %c0_i32, %c0_i32_0, %c0_i32_1 : i32, i32, i32, i32
  }
  func.func @transform_3(%arg0: i32) -> (i32, i32, i32, i32) {
    %c0_i32 = arith.constant 0 : i32
    %c0_i32_0 = arith.constant 0 : i32
    %c0_i32_1 = arith.constant 0 : i32
    %c0_i32_2 = arith.constant 0 : i32
    return %arg0, %c0_i32, %c0_i32_0, %c0_i32_1 : i32, i32, i32, i32
  }
  func.func @transform_4(%arg0: i32) -> (i32, i32, i32) {
    %c0_i32 = arith.constant 0 : i32
    %c0_i32_0 = arith.constant 0 : i32
    %c0_i32_1 = arith.constant 0 : i32
    %c0_i32_2 = arith.constant 0 : i32
    return %c0_i32, %c0_i32_0, %c0_i32_1 : i32, i32, i32
  }
  func.func @transform_5(%arg0: i32) -> (i32, i32, i32) {
    %c0_i32 = arith.constant 0 : i32
    %c0_i32_0 = arith.constant 0 : i32
    %c0_i32_1 = arith.constant 0 : i32
    %c0_i32_2 = arith.constant 0 : i32
    return %c0_i32, %c0_i32_0, %c0_i32_1 : i32, i32, i32
  }
  func.func @transform_6(%arg0: i32) -> (i32, i32, i32) {
    %c0_i32 = arith.constant 0 : i32
    %c0_i32_0 = arith.constant 0 : i32
    %c0_i32_1 = arith.constant 0 : i32
    %c0_i32_2 = arith.constant 0 : i32
    return %c0_i32, %c0_i32_0, %c0_i32_1 : i32, i32, i32
  }
  func.func @transform_7(%arg0: i32) -> (i32, i32) {
    %c0_i32 = arith.constant 0 : i32
    %c0_i32_0 = arith.constant 0 : i32
    %c0_i32_1 = arith.constant 0 : i32
    return %c0_i32, %c0_i32_0 : i32, i32
  }
}

</mosaic_0001>

<bundles_post_ra>
// kernel: tpu_custom_call.1
= control target key start
LH: loop header
LB: loop body
LE: loop exit
PB: predicated region body
PF: predicated region fallthrough
CT: control target
= control target key end

     0   :  { %s1406_s0 = inlined_call_operand.<no memory space> [shape: f32[1,1], index: 0, kind: input, shape index: {}]   ;;  %s1407_s1 = inlined_call_operand.hbm [shape: f32[2,2,16,16], index: 1, kind: input, shape index: {}]   ;;  %s1408_s2 = inlined_call_operand.hbm [shape: f32[2,2,16,16], index: 2, kind: input, shape index: {}]   ;;  %s1409_s3 = inlined_call_operand.hbm [shape: f32[2,2,16,16], index: 3, kind: input, shape index: {}]   ;;  %s1410_s4 = inlined_call_operand.hbm [shape: f32[2,16,16], index: 4, kind: input, shape index: {}]   ;;  %s1411_s5 = inlined_call_operand.hbm [shape: f32[2,16,16], index: 5, kind: input, shape index: {}]   ;;  %s1412_s6 = inlined_call_operand.hbm [shape: f32[2,16,16], index: 6, kind: input, shape index: {}]   ;;  %s1413_s7 = inlined_call_operand.hbm [shape: f32[1,1], index: 7, kind: output, shape index: {}]  }
   0x1   :  { %1415 = sst [smem:[#allocation23_spill]] %s1408_s2 }
   0x2   :  { %1416 = sst [smem:[#allocation24_spill]] %s1410_s4 }
   0x3   :  { %12 = sst [smem:[#allocation5]] %s1406_s0 }
   0x4   :  { %13 = vsyncpa [#allocation7], 0 }
   0x5   :  { %15 = vsyncpa [#allocation7 + $0x1], 0 }
   0x6   :  { %16 = vsyncpa [#allocation10], 0 }
   0x7   :  { %18 = vsyncpa [#allocation10 + $0x1], 0 }
   0x8   :  { %19 = vsyncpa [#allocation13], 0 }
   0x9   :  { %20 = vsyncpa [#allocation16], 0 }
   0xa   :  { %21 = vsyncpa [#allocation8], 0  ;;  %s1165_s26 = smov 0   ;;  %s1167_s27 = smov 0  }
   0xb   :  { %s1169_s28 = smov 0   ;;  %s1171_s29 = smov 0  }
   0xc LB: > { %s1184_s0 = sadd.s32 4294967295, %s1113_s29   ;;  %p68_p0 = scmp.ne.s32.totalorder %s1105_s27, %s1101_s26  ;;  %s1113_s29 = sphi %s1171_s29, %s1427_s29   ;;  %s1109_s28 = sphi %s1169_s28, %s1426_s28   ;;  %s1105_s27 = sphi %s1167_s27, %s1425_s27   ;;  %s1101_s26 = sphi %s1165_s26, %s1424_s26  }
   0xd   : > { %p69_p1 = scmp.eq.s32.totalorder %s1184_s0, 0  ;;  %p729_p2 = scmp.ge.s32.totalorder %s1113_s29, 1 }
   0xe   : > { %p215_p3 = scmp.lt.s32.totalorder %s1113_s29, 3  ;;  %p730_p4 = scmp.ne.s32.totalorder %s1184_s0, 0 }
   0xf   : > { %p1193_p5 = por %p69_p1, %p68_p0  ;;  %s1418_s4 = sld [smem:[#allocation24_spill]] }
  0x10   : > { %p1200_p6 = pnand %p729_p2, %p215_p3  ;;  %s1115_s12 = smov [#allocation12]  }
  0x11   : > { %s231_s13 = sshll.u32 %s1115_s12, 4  ;;  %s1213_s15 = sadd.s32 1, %s1113_s29   ;;  %s232_s13 = int_to_ptr.vmem [resolvable:$true] %s231_s13 }
  0x12   : > { %p787_p7 = pneg %p1200_p6  ;;  %s1116_s16 = smov 128  }
  0x13   : > { %s1117_s17 = smov 8   ;;  %s52_s18 = ssub.s32 %s1113_s29, %s1213_s15 }
  0x14   : > { %p1208_p8 = pnand %p787_p7, %p69_p1  ;;  %s55_s19 = sadd.s32 1, %s1109_s28 }
  0x15   : > { %s229_s10 = sshll.u32 %s1418_s4, 4  ;;  %p53_p9 = scmp.eq.s32.totalorder %s52_s18, 0  ;;  %s230_s10 = int_to_ptr.hbm [resolvable:$true] %s229_s10 }
  0x16   : > { %790 = dma.hbm_to_vmem [thread:$0]  (!%p1208_p8), %s230_s10, 512, %s232_s13, [#allocation13], %s1116_s16, %s1116_s16, %s1117_s17  }
  0x17   : > { %p62_p10 = scmp.ne.s32.totalorder %s1109_s28, %s1105_s27  ;;  %p63_p11 = scmp.eq.s32.totalorder %s1113_s29, 0 }
  0x18   : > { %p810_p12 = scmp.lt.s32.totalorder %s1113_s29, 2  ;;  %s1414_s21 = sand.u32 1, %s1109_s28  }
  0x19   : > { %s1228_s20 = scalar_select %p53_p9, %s1109_s28, %s55_s19  }
  0x1a   : > { %p64_p13 = por %p63_p11, %p62_p10  ;;  %s1233_s22 = sshll.u32 %s1414_s21, 5 }
  0x1b   : > { %s1236_s23 = sshll.u32 %s1113_s29, 5  ;;  %s295_s25 = sand.u32 1, %s1113_s29  }
  0x1c   : > { %p1238_p0 = pnand %p810_p12, %p64_p13  ;;  %s1422_s2 = sld [smem:[#allocation23_spill]] }
  0x1d   : > { %s299_s12 = scalar_lea.vmem [#allocation9], %s1233_s22  ;;  %s1248_s18 = scalar_lea.sflag [#allocation10], %s295_s25 }
  0x1e   : > { %s307_s13 = sshll.u32 %s299_s12, 4  ;;  %p889_p3 = pneg %p1238_p0  ;;  %s308_s13 = int_to_ptr.vmem [resolvable:$true] %s307_s13 }
  0x22   : > { %s304_s9 = scalar_lea.hbm %s1422_s2, %s1236_s23  ;;  %s892_s8 = scalar_lea.hbm %s1422_s2, 64 }
  0x23   : > { %s305_s10 = sshll.u32 %s304_s9, 4  ;;  %s306_s10 = int_to_ptr.hbm [resolvable:$true] %s305_s10 }
  0x24   : > { %s885_s19 = sshra.s32 %s306_s10, 4  ;;  %s886_s19 = int_to_ptr.hbm [resolvable:$true] %s885_s19 }
  0x25   : > { %s887_s21 = scalar_lea.hbm %s886_s19, 32  ;;  %p893_p10 = scmp.lt.s32.totalorder %s886_s19, %s1422_s2 }
  0x26   : > { %p888_p2 = scmp.ne.s32.totalorder %s886_s19, %s887_s21  ;;  %p894_p11 = scmp.lt.s32.totalorder %s892_s8, %s887_s21 }
  0x28   : > { %p890_p7 = pnand %p889_p3, %p888_p2  ;;  %p895_p12 = por %p894_p11, %p893_p10 }
  0x2a   : > { %p891_p9 = pneg %p890_p7 }
  0x2c   : > { %p896_p13 = pnand %p895_p12, %p891_p9 }
  0x2e   : > { %899 = shalt.err (!%p896_p13)
}
  0x2f   : > { %803 = dma.hbm_to_vmem [thread:$0]  (!%p1238_p0), %s306_s10, 512, %s308_s13, %s1248_s18, %s1116_s16, %s1116_s16, %s1117_s17  }
  0x30   : > { %s243_s26 = sshll.u32 %s1411_s5, 4  ;;  %s1118_s21 = smov [#allocation14]   ;;  %s244_s26 = int_to_ptr.hbm [resolvable:$true] %s243_s26 }
  0x31   : > { %s245_s19 = sshll.u32 %s1118_s21, 4  ;;  %s257_s12 = sshll.u32 %s1412_s6, 4  ;;  %s246_s19 = int_to_ptr.vmem [resolvable:$true] %s245_s19  ;;  %s258_s12 = int_to_ptr.hbm [resolvable:$true] %s257_s12 }
  0x32   : > { %793 = dma.hbm_to_vmem [thread:$0]  (!%p1208_p8), %s244_s26, 512, %s246_s19, [#allocation13], %s1116_s16, %s1116_s16, %s1117_s17  }
  0x33   : > { %s1119_s10 = smov [#allocation15]   ;;  %s282_s21 = scalar_lea.hbm %s1407_s1, %s1236_s23 }
  0x34   : > { %s259_s13 = sshll.u32 %s1119_s10, 4  ;;  %s277_s8 = scalar_lea.vmem [#allocation6], %s1233_s22  ;;  %s260_s13 = int_to_ptr.vmem [resolvable:$true] %s259_s13 }
  0x35   : > { %796 = dma.hbm_to_vmem [thread:$0]  (!%p1208_p8), %s258_s12, 512, %s260_s13, [#allocation16], %s1116_s16, %s1116_s16, %s1117_s17  }
  0x36   : > { %s285_s9 = sshll.u32 %s277_s8, 4  ;;  %s283_s2 = sshll.u32 %s282_s21, 4  ;;  %s286_s9 = int_to_ptr.vmem [resolvable:$true] %s285_s9  ;;  %s284_s2 = int_to_ptr.hbm [resolvable:$true] %s283_s2 }
  0x37   : > { %s1423_s26 = sand.u32 1, %s1109_s28   ;;  %s975_s4 = sshra.s32 %s284_s2, 4  ;;  %s976_s4 = int_to_ptr.hbm [resolvable:$true] %s975_s4 }
  0x38   : > { %s274_s19 = scalar_lea.sflag [#allocation7], %s1423_s26  ;;  %s977_s10 = scalar_lea.hbm %s976_s4, 32 }
  0x39   : > { %p978_p2 = scmp.ne.s32.totalorder %s976_s4, %s977_s10  ;;  %s982_s13 = scalar_lea.hbm %s1407_s1, 64 }
  0x3a   : > { %p983_p8 = scmp.lt.s32.totalorder %s976_s4, %s1407_s1  ;;  %p984_p10 = scmp.lt.s32.totalorder %s982_s13, %s977_s10 }
  0x3b   : > { %p980_p7 = pnand %p978_p2, %p889_p3 }
  0x3c   : > { %p985_p11 = por %p984_p10, %p983_p8 }
  0x3d   : > { %p981_p9 = pneg %p980_p7 }
  0x3f   : > { %p986_p12 = pnand %p985_p11, %p981_p9 }
  0x41   : > { %989 = shalt.err (!%p986_p12)
}
  0x42   : > { %800 = dma.hbm_to_vmem [thread:$0]  (!%p1238_p0), %s284_s2, 512, %s286_s9, %s274_s19, %s1116_s16, %s1116_s16, %s1117_s17  }
  0x43   : > { %s326_s26 = scalar_lea.hbm %s1409_s3, %s1236_s23  ;;  %s321_s14 = scalar_lea.vmem [#allocation11], %s1233_s22 }
  0x44   : > { %s329_s12 = sshll.u32 %s321_s14, 4  ;;  %s327_s4 = sshll.u32 %s326_s26, 4  ;;  %s330_s12 = int_to_ptr.vmem [resolvable:$true] %s329_s12  ;;  %s328_s4 = int_to_ptr.hbm [resolvable:$true] %s327_s4 }
  0x45   : > { %s1005_s10 = sshra.s32 %s328_s4, 4  ;;  %s1012_s2 = scalar_lea.hbm %s1409_s3, 64  ;;  %s1006_s10 = int_to_ptr.hbm [resolvable:$true] %s1005_s10 }
  0x46   : > { %s1007_s13 = scalar_lea.hbm %s1006_s10, 32  ;;  %p1013_p9 = scmp.lt.s32.totalorder %s1006_s10, %s1409_s3 }
  0x47   : > { %p1008_p13 = scmp.ne.s32.totalorder %s1006_s10, %s1007_s13  ;;  %p1014_p8 = scmp.lt.s32.totalorder %s1012_s2, %s1007_s13 }
  0x49   : > { %p1010_p2 = pnand %p1008_p13, %p889_p3  ;;  %p1015_p10 = por %p1014_p8, %p1013_p9 }
  0x4b   : > { %p1011_p7 = pneg %p1010_p2 }
  0x4d   : > { %p1016_p11 = pnand %p1015_p10, %p1011_p7 }
  0x4f   : > { %1019 = shalt.err (!%p1016_p11)
}
  0x50   : > { %806 = dma.hbm_to_vmem [thread:$0]  (!%p1238_p0), %s328_s4, 512, %s330_s12, %s1248_s18, %s1116_s16, %s1116_s16, %s1117_s17  }
  0x51   : > { %341 = sbr.rel (%p1200_p6) target bundleno = 343 (0x157), region = 48  ;;  %s343_s22 = sand.u32 (!%p1200_p6), 1, %s1105_s27  }
  0x52   : > { %s744_s23 = sshll.u32 (!%p1200_p6), %s343_s22, 5  ;;  %s344_s21 = scalar_lea.sflag (!%p1200_p6), [#allocation7], %s343_s22 }
  0x53   : > { %s1327_s8 = scalar_lea.vmem (!%p1200_p6), [#allocation6], %s744_s23 }
  0x56   : > { %1080 = dma.done.wait (%p1193_p5), %s344_s21, 512  }
  0x57   : > { %1082 = vsyncadd (%p1193_p5), %s344_s21, 4294966784  ;;  %s353_s24 = sand.u32 1, %s1184_s0   ;;  %s1334_s16 = scalar_lea.vmem [#allocation9], %s744_s23 }
  0x58   : > { %s354_s26 = scalar_lea.sflag [#allocation10], %s353_s24 }
  0x59   : > { %1084 = dma.done.wait (%p1193_p5), %s354_s26, 1024  }
  0x5a   : > { %1086 = vsyncadd (%p1193_p5), %s354_s26, 4294966272  ;;  %s1340_s11 = scalar_lea.vmem [#allocation11], %s744_s23 }
  0x5b   : > { %1088 = dma.done.wait (%p69_p1), [#allocation13], 1024  }
  0x5c   : > { %1090 = vsyncadd (%p69_p1), [#allocation13], 4294966272 }
  0x5d   : > { %1092 = dma.done.wait (%p69_p1), [#allocation16], 512  }
  0x5e   : > { %1094 = vsyncadd (%p69_p1), [#allocation16], 4294966784  ;;  %422 = sbr.rel (%p730_p4) target bundleno = 112 (0x70), region = 76 }
  0x63   : > { %vm423_vm0 = vcmask 130048   ;;  %v1120_v0 = vmov 0.0  }
  0x64   : > { %424 = vst.msk [vmem:[#allocation2] sm:$0xff] %vm423_vm0, %v1120_v0 }
  0x65   : > { %425 = vst.msk [vmem:[#allocation2 + $0x8] sm:$0xff] %vm423_vm0, %v1120_v0 }
  0x66   : > { %426 = vst.msk [vmem:[#allocation2 + $0x10] sm:$0xff] %vm423_vm0, %v1120_v0 }
  0x67   : > { %427 = vst.msk [vmem:[#allocation2 + $0x18] sm:$0xff] %vm423_vm0, %v1120_v0 }
  0x68   : > { %428 = vst.msk [vmem:[#allocation3] sm:$0xff] %vm423_vm0, %v1120_v0 }
  0x69   : > { %429 = vst.msk [vmem:[#allocation3 + $0x8] sm:$0xff] %vm423_vm0, %v1120_v0 }
  0x6a   : > { %430 = vst.msk [vmem:[#allocation3 + $0x10] sm:$0xff] %vm423_vm0, %v1120_v0 }
  0x6b   : > { %431 = vst.msk [vmem:[#allocation3 + $0x18] sm:$0xff] %vm423_vm0, %v1120_v0 }
  0x6c   : > { %432 = vst.msk [vmem:[#allocation4] sm:$0xff] %vm423_vm0, %v1120_v0 }
  0x6d   : > { %433 = vst.msk [vmem:[#allocation4 + $0x8] sm:$0xff] %vm423_vm0, %v1120_v0 }
  0x6e   : > { %434 = vst.msk [vmem:[#allocation4 + $0x10] sm:$0xff] %vm423_vm0, %v1120_v0 }
  0x6f   : > { %435 = vst.msk [vmem:[#allocation4 + $0x18] sm:$0xff] %vm423_vm0, %v1120_v0 }
  0x70 PF: > { %v436_v1 = vld [vmem:[%s1327_s8] sm:$0xff]  ;;  %v437_v4 = vld [vmem:[%s1327_s8 + $0x8] sm:$0xff]  ;;  %v438_v8 = vld [vmem:[%s1327_s8 + $0x10] sm:$0xff]  ;;  %vm484_vm1 = vcmask 130048   ;;  %p751_p1 = scmp.ne.s32.totalorder %s1184_s0, 1 }
  0x71   : > { %v440_v2 = vld [vmem:[#allocation12] sm:$0xff]  ;;  %v441_v5 = vld [vmem:[#allocation12 + $0x8] sm:$0xff]  ;;  %v442_v9 = vld [vmem:[#allocation12 + $0x10] sm:$0xff]  ;;  %s590_s17 = sld [smem:[#allocation5]] (!%p751_p1) }
  0x72   : > { %v444_v3 = vsub.f32 %v436_v1, %v440_v2  ;;  %v472_v6 = vld [vmem:[#allocation2] sm:$0xff]  ;;  %v445_v7 = vsub.f32 %v437_v4, %v441_v5  ;;  %v473_v11 = vld [vmem:[#allocation2 + $0x8] sm:$0xff]  ;;  %v446_v12 = vsub.f32 %v438_v8, %v442_v9  ;;  %v439_v13 = vld [vmem:[%s1327_s8 + $0x18] sm:$0xff] }
  0x73   : > { %v443_v14 = vld [vmem:[#allocation12 + $0x18] sm:$0xff]  ;;  %v474_v16 = vld [vmem:[#allocation2 + $0x10] sm:$0xff]  ;;  %v448_v18 = vld [vmem:[%s1334_s16] sm:$0xff] }
  0x74   : > { %v476_v10 = vmul.f32 %v444_v3, %v444_v3  ;;  %v477_v15 = vmul.f32 %v445_v7, %v445_v7  ;;  %v447_v17 = vsub.f32 %v439_v13, %v443_v14  ;;  %v452_v19 = vld [vmem:[#allocation14] sm:$0xff]  ;;  %v478_v21 = vmul.f32 %v446_v12, %v446_v12  ;;  %v475_v22 = vld [vmem:[#allocation2 + $0x18] sm:$0xff]  ;;  %v449_v24 = vld [vmem:[%s1334_s16 + $0x8] sm:$0xff] }
  0x75   : > { %v456_v23 = vsub.f32 %v448_v18, %v452_v19  ;;  %v453_v25 = vld [vmem:[#allocation14 + $0x8] sm:$0xff]  ;;  %v489_v28 = vld [vmem:[#allocation3] sm:$0xff]  ;;  %v450_v30 = vld [vmem:[%s1334_s16 + $0x10] sm:$0xff] }
  0x76   : > { %v480_v20 = vadd.f32 %v476_v10, %v472_v6  ;;  %v481_v26 = vadd.f32 %v477_v15, %v473_v11  ;;  %v479_v27 = vmul.f32 %v447_v17, %v447_v17  ;;  %v457_v29 = vsub.f32 %v449_v24, %v453_v25  ;;  %v454_v31 = vld [vmem:[#allocation14 + $0x10] sm:$0xff]  ;;  %v490_v34 = vld [vmem:[#allocation3 + $0x8] sm:$0xff]  ;;  %v451_v36 = vld [vmem:[%s1334_s16 + $0x18] sm:$0xff] }
  0x77   : > { %v482_v32 = vadd.f32 %v478_v21, %v474_v16  ;;  %v493_v33 = vmul.f32 %v456_v23, %v456_v23  ;;  %v458_v35 = vsub.f32 %v450_v30, %v454_v31  ;;  %v455_v37 = vld [vmem:[#allocation14 + $0x18] sm:$0xff]  ;;  %v491_v40 = vld [vmem:[#allocation3 + $0x10] sm:$0xff]  ;;  %v460_v42 = vld [vmem:[%s1340_s11] sm:$0xff] }
  0x78   : > { %485 = vst.msk [vmem:[#allocation2] sm:$0xff] %vm484_vm1, %v480_v20  ;;  %v483_v38 = vadd.f32 %v479_v27, %v475_v22  ;;  %v494_v39 = vmul.f32 %v457_v29, %v457_v29  ;;  %v459_v41 = vsub.f32 %v451_v36, %v455_v37  ;;  %v464_v43 = vld [vmem:[#allocation15] sm:$0xff]  ;;  %v492_v46 = vld [vmem:[#allocation3 + $0x18] sm:$0xff]  ;;  %v461_v48 = vld [vmem:[%s1340_s11 + $0x8] sm:$0xff] }
  0x79   : > { %486 = vst.msk [vmem:[#allocation2 + $0x8] sm:$0xff] %vm484_vm1, %v481_v26  ;;  %v497_v44 = vadd.f32 %v493_v33, %v489_v28  ;;  %v495_v45 = vmul.f32 %v458_v35, %v458_v35  ;;  %v468_v47 = vsub.f32 %v460_v42, %v464_v43  ;;  %v465_v49 = vld [vmem:[#allocation15 + $0x8] sm:$0xff]  ;;  %v505_v52 = vld [vmem:[#allocation4] sm:$0xff]  ;;  %v462_v54 = vld [vmem:[%s1340_s11 + $0x10] sm:$0xff] }
  0x7a   : > { %487 = vst.msk [vmem:[#allocation2 + $0x10] sm:$0xff] %vm484_vm1, %v482_v32  ;;  %v498_v50 = vadd.f32 %v494_v39, %v490_v34  ;;  %v496_v51 = vmul.f32 %v459_v41, %v459_v41  ;;  %v469_v53 = vsub.f32 %v461_v48, %v465_v49  ;;  %v466_v55 = vld [vmem:[#allocation15 + $0x10] sm:$0xff]  ;;  %v506_v58 = vld [vmem:[#allocation4 + $0x8] sm:$0xff]  ;;  %v463_v60 = vld [vmem:[%s1340_s11 + $0x18] sm:$0xff] }
  0x7b   : > { %488 = vst.msk [vmem:[#allocation2 + $0x18] sm:$0xff] %vm484_vm1, %v483_v38  ;;  %v499_v56 = vadd.f32 %v495_v45, %v491_v40  ;;  %v509_v57 = vmul.f32 %v468_v47, %v468_v47  ;;  %v470_v59 = vsub.f32 %v462_v54, %v466_v55  ;;  %v467_v61 = vld [vmem:[#allocation15 + $0x18] sm:$0xff]  ;;  %v507_v0 = vld [vmem:[#allocation4 + $0x10] sm:$0xff] }
  0x7c   : > { %501 = vst.msk [vmem:[#allocation3] sm:$0xff] %vm484_vm1, %v497_v44  ;;  %v500_v62 = vadd.f32 %v496_v51, %v492_v46  ;;  %v510_v63 = vmul.f32 %v469_v53, %v469_v53  ;;  %v471_v1 = vsub.f32 %v463_v60, %v467_v61  ;;  %v508_v4 = vld [vmem:[#allocation4 + $0x18] sm:$0xff] }
  0x7d   : > { %502 = vst.msk [vmem:[#allocation3 + $0x8] sm:$0xff] %vm484_vm1, %v498_v50  ;;  %v513_v2 = vadd.f32 %v509_v57, %v505_v52  ;;  %v511_v3 = vmul.f32 %v470_v59, %v470_v59 }
  0x7e   : > { %503 = vst.msk [vmem:[#allocation3 + $0x10] sm:$0xff] %vm484_vm1, %v499_v56  ;;  %v514_v5 = vadd.f32 %v510_v63, %v506_v58  ;;  %v512_v6 = vmul.f32 %v471_v1, %v471_v1 }
  0x7f   : > { %504 = vst.msk [vmem:[#allocation3 + $0x18] sm:$0xff] %vm484_vm1, %v500_v62  ;;  %v515_v7 = vadd.f32 %v511_v3, %v507_v0  ;;  %524 = sbr.rel (%p751_p1) target bundleno = 338 (0x152), region = 80 }
  0x80   : > { %517 = vst.msk [vmem:[#allocation4] sm:$0xff] %vm484_vm1, %v513_v2  ;;  %v516_v8 = vadd.f32 %v512_v6, %v508_v4 }
  0x81   : > { %518 = vst.msk [vmem:[#allocation4 + $0x8] sm:$0xff] %vm484_vm1, %v514_v5 }
  0x82   : > { %519 = vst.msk [vmem:[#allocation4 + $0x10] sm:$0xff] %vm484_vm1, %v515_v7 }
  0x83   : > { %520 = vst.msk [vmem:[#allocation4 + $0x18] sm:$0xff] %vm484_vm1, %v516_v8 }
  0x84   : > { %v525_v9 = vld [vmem:[#allocation2] sm:$0xff]  ;;  %v526_v10 = vld [vmem:[#allocation2 + $0x8] sm:$0xff]  ;;  %v527_v11 = vld [vmem:[#allocation2 + $0x10] sm:$0xff]  ;;  %vm595_vm2 = vcmask 0  }
  0x85   : > { %v528_v12 = vld [vmem:[#allocation2 + $0x18] sm:$0xff]  ;;  %v529_v13 = vsel %vm484_vm1, %v525_v9, 0.0  ;;  %v530_v14 = vsel %vm484_vm1, %v526_v10, 0.0  ;;  %v532_v15 = vsel %vm484_vm1, %v527_v11, 0.0  ;;  %v546_v23 = vld [vmem:[#allocation3] sm:$0xff]  ;;  %v547_v27 = vld [vmem:[#allocation3 + $0x8] sm:$0xff] }
  0x86   : > { %v531_v18 = vadd.f32 %v530_v14, %v529_v13  ;;  %v534_v24 = vsel %vm484_vm1, %v528_v12, 0.0  ;;  %v548_v28 = vld [vmem:[#allocation3 + $0x10] sm:$0xff]  ;;  %v550_v29 = vsel %vm484_vm1, %v546_v23, 0.0  ;;  %v551_v32 = vsel %vm484_vm1, %v547_v27, 0.0  ;;  %v549_v37 = vld [vmem:[#allocation3 + $0x18] sm:$0xff] }
  0x87   : > { %v568_v16 = vld [vmem:[#allocation4] sm:$0xff]  ;;  %v552_v34 = vadd.f32 %v551_v32, %v550_v29  ;;  %v553_v35 = vsel %vm484_vm1, %v548_v28, 0.0  ;;  %v555_v40 = vsel %vm484_vm1, %v549_v37, 0.0 }
  0x88   : > { %v569_v17 = vld [vmem:[#allocation4 + $0x8] sm:$0xff]  ;;  %v572_v21 = vsel %vm484_vm1, %v568_v16, 0.0  ;;  %v533_v30 = vadd.f32 %v532_v15, %v531_v18 }
  0x89   : > { %v570_v19 = vld [vmem:[#allocation4 + $0x10] sm:$0xff]  ;;  %v573_v22 = vsel %vm484_vm1, %v569_v17, 0.0  ;;  %v554_v39 = vadd.f32 %v553_v35, %v552_v34 }
  0x8a   : > { %v571_v20 = vld [vmem:[#allocation4 + $0x18] sm:$0xff]  ;;  %v574_v25 = vadd.f32 %v573_v22, %v572_v21  ;;  %v575_v26 = vsel %vm484_vm1, %v570_v19, 0.0  ;;  %v535_v36 = vadd.f32 %v534_v24, %v533_v30 }
  0x8b   : > { %v577_v31 = vsel %vm484_vm1, %v571_v20, 0.0  ;;  %v556_v41 = vadd.f32 %v555_v40, %v554_v39 }
  0x8c   : > { %v576_v33 = vadd.f32 %v575_v26, %v574_v25  ;;  %536 = vadd.xlane.f32.xlu0 %v535_v36 }
  0x8e   : > { %v578_v38 = vadd.f32 %v577_v31, %v576_v33 }
  0x90   : > { %579 = vadd.xlane.f32.xlu1 %v578_v38 }
  0x94   : > { %557 = vadd.xlane.f32.xlu0 %v556_v41 }
  0xff   : > { %v537_v42 = vpop.xlane.xlu0 %536 }
 0x100   : > { %v538_v43 = vrot.slane %v537_v42, 4 }
 0x102   : > { %v539_v46 = vadd.f32 %v538_v43, %v537_v42 }
 0x103   : > { %v580_v44 = vpop.xlane.xlu1 %579 }
 0x104   : > { %v581_v45 = vrot.slane %v580_v44, 4  ;;  %v540_v48 = vrot.slane %v539_v46, 2 }
 0x106   : > { %v582_v47 = vadd.f32 %v581_v45, %v580_v44  ;;  %v541_v49 = vadd.f32 %v540_v48, %v539_v46 }
 0x107   : > { %v558_v51 = vpop.xlane.xlu0 %557 }
 0x108   : > { %v583_v50 = vrot.slane %v582_v47, 2  ;;  %v559_v52 = vrot.slane %v558_v51, 4  ;;  %v542_v53 = vrot.slane %v541_v49, 1 }
 0x10a   : > { %v560_v54 = vadd.f32 %v559_v52, %v558_v51  ;;  %v543_v55 = vadd.f32 %v542_v53, %v541_v49  ;;  %v584_v56 = vadd.f32 %v583_v50, %v582_v47 }
 0x10c   : > { %v561_v57 = vrot.slane %v560_v54, 2  ;;  %759 = vpush %v543_v55  ;;  %v585_v59 = vrot.slane %v584_v56, 1 }
 0x10e   : > { %v562_v58 = vadd.f32 %v561_v57, %v560_v54  ;;  %v586_v62 = vadd.f32 %v585_v59, %v584_v56 }
 0x110   : > { %v563_v60 = vrot.slane %v562_v58, 1 }
 0x112   : > { %v564_v61 = vadd.f32 %v563_v60, %v562_v58 }
 0x114   : > { %761 = vpush %v564_v61 }
 0x115   : > { %763 = vpush %v586_v62 }
 0x13d   : > { %s760_s30 = spop %759 }
 0x13e   : > { %s545_s18 = smul.f32 0.00390625, %s760_s30 }
 0x145   : > { %s762_s14 = spop %761 }
 0x146   : > { %s566_s12 = smul.f32 0.00390625, %s762_s14  ;;  %s764_s4 = spop %763 }
 0x147   : > { %s588_s13 = smul.f32 0.00390625, %s764_s4 }
 0x148   : > { %s567_s10 = sadd.f32 %s566_s12, %s545_s18 }
 0x14a   : > { %s589_s25 = sadd.f32 %s588_s13, %s567_s10 }
 0x14c   : > { %s591_s29 = smul.f32 %s590_s17, %s589_s25 }
 0x14e   : > { %s592_s2 = smul.f32 0.5, %s591_s29 }
 0x150   : > { %v593_v63 = vstv %s592_s2 }
 0x151   : > { %596 = vst.msk [vmem:[#allocation17] sm:$0x1] %vm595_vm2, %v593_v63 }
 0x152 PF: > { %p814_p4 = scmp.eq.s32.totalorder %s1184_s0, 1  ;;  %s1121_s9 = smov [#allocation17]  }
 0x153   : > { %s603_s19 = sshll.u32 %s1121_s9, 4  ;;  %s605_s21 = sshll.u32 %s1413_s7, 4  ;;  %s604_s19 = int_to_ptr.vmem [resolvable:$true] %s603_s19  ;;  %s606_s21 = int_to_ptr.hbm [resolvable:$true] %s605_s21 }
 0x154   : > { %784 = dma.vmem_to_hbm [thread:$0]  (%p814_p4), %s604_s19, 16, %s606_s21, [#allocation8]  }
 0x155   : > { %1096 = dma.done.wait (%p814_p4), [#allocation8], 16  }
 0x156   : > { %1098 = vsyncadd (%p814_p4), [#allocation8], 4294967280 }
 0x157 PF: > { %p24_p5 = scmp.ge.s32.totalorder %s1213_s15, 4   ;;  %s1424_s26 = smov %s1105_s27 }
 0x158   : > { %s1425_s27 = smov %s1109_s28  ;;  %s1426_s28 = smov %s1228_s20 }
 0x159   : > { %s1427_s29 = smov %s1213_s15  ;;  %26 = sbr.rel (!%p24_p5) target bundleno = 12 (0xc), region = 129 }
 0x15e   :  { %619 = vsyncpa [#allocation7], 1 }
 0x15f   :  { %621 = vsyncpa [#allocation7 + $0x1], 1 }
 0x160   :  { %622 = vsyncpa [#allocation10], 1 }
 0x161   :  { %624 = vsyncpa [#allocation10 + $0x1], 1 }
 0x162   :  { %625 = vsyncpa [#allocation13], 1 }
 0x163   :  { %626 = vsyncpa [#allocation16], 1 }
 0x164   :  { %627 = vsyncpa [#allocation8], 1 }
 0x165   :  { %629 = vsyncpa [#allocation8 + $0x1], 1 }

</bundles_post_ra>
